<compile_context>
chip_gen: v7x
topology: tpu7x:2x2x1
jax: 0.10.0
libtpu: 0.0.40
codegen_flags: <defaults>
</compile_context>

<pallas_src>
import functools

import jax
import jax.numpy as jnp
from jax.experimental import pallas as pl
from jax.experimental.pallas import tpu as pltpu


# ----------------------------------------------------------------------------
# Hardware capabilities / budgets
# ----------------------------------------------------------------------------

def _tpu_caps():
    """Return (vmem_capacity_bytes, has_native_bf16_vpu) with safe fallbacks."""
    kind = ""
    try:
        kind = jax.devices()[0].device_kind.lower()
    except Exception:
        pass

    vmem_bytes = None
    try:
        vmem_bytes = int(pltpu.get_tpu_info().vmem_capacity_bytes)
    except Exception:
        vmem_bytes = None
    if not vmem_bytes or vmem_bytes <= 0:
        # v7x-class parts have 64 MiB VMEM per TensorCore; v5e/v6e have 128 MiB.
        vmem_bytes = (64 << 20) if "v7" in kind else (128 << 20)
    vmem_bytes = max(int(vmem_bytes), 32 << 20)

    # v5e and older have no bf16 VALU: keep the elementwise multiply in f32 there.
    old_gen = any(t in kind for t in ("v2", "v3", "v4", "v5"))
    return vmem_bytes, (not old_gen)


def _budgets(vmem_bytes):
    """(io_budget, scoped_vmem_clamp) sized against physical VMEM."""
    io_budget = int(vmem_bytes * 0.4)                      # ~25 MiB (64 MiB part) / ~51 MiB (128 MiB)
    clamp_hi = min(int(vmem_bytes * 0.7), vmem_bytes - (32 << 20))
    clamp_hi = max(clamp_hi, int(vmem_bytes * 0.5), 16 << 20)
    return io_budget, clamp_hi


# ----------------------------------------------------------------------------
# Kernels
# ----------------------------------------------------------------------------

def _se_fused_kernel(x_ref, w1t_ref, w2t_ref, o_ref, *, spatial_axis, mul_in_f32):
    """Fused squeeze/excite/scale on a resident block of whole images.

    spatial_axis=1: channels-last block (Nb, HW, C)  (mean over sublanes)
    spatial_axis=2: channels-first block (Nb, C, HW) (mean over lanes, XLU reduce)
    w1t_ref: (C, C_red)   w2t_ref: (C_red, C)
    """
    hw = x_ref.shape[spatial_axis]

    # Squeeze: spatial mean, accumulated in f32 (fused convert+reduce).
    m = jnp.sum(x_ref[...], axis=spatial_axis, dtype=jnp.float32) * (1.0 / hw)   # (Nb, C)

    # Excite: two tiny matmuls + relu + sigmoid (negligible FLOPs, hidden under DMA).
    h = jnp.maximum(
        jnp.dot(m, w1t_ref[...], preferred_element_type=jnp.float32), 0.0)       # (Nb, C_red)
    s = jax.nn.sigmoid(
        jnp.dot(h, w2t_ref[...], preferred_element_type=jnp.float32))            # (Nb, C)

    s_b = s[:, None, :] if spatial_axis == 1 else s[:, :, None]
    if mul_in_f32:
        # f32 activations, or bf16 on parts without a bf16 VPU (v5e and older).
        o_ref[...] = (x_ref[...].astype(jnp.float32) * s_b).astype(o_ref.dtype)
    else:
        # Native-dtype multiply (bf16 VPU on v6e/v7x): no block-sized f32 temporaries.
        o_ref[...] = x_ref[...] * s_b.astype(x_ref.dtype)


def _se_scale_kernel(s_ref, x_ref, o_ref):
    """Streaming scale: o = x * s (s broadcast over the tiled spatial axis)."""
    o_ref[...] = (x_ref[...].astype(s_ref.dtype) * s_ref[...]).astype(o_ref.dtype)


# ----------------------------------------------------------------------------
# Fused-path planning / call
# ----------------------------------------------------------------------------

def _plan_fused(N, per_image_io, per_image_f32, weight_bytes, io_budget, clamp_hi,
                mul_in_f32):
    """Return (nb, vmem_limit) for the fused path, or None if one image doesn't fit."""
    # Double-buffered in + out blocks, plus in-kernel f32 temporaries (upcast/product).
    n_f32_tmp = 2 if mul_in_f32 else 1
    per_image = 4 * per_image_io + n_f32_tmp * per_image_f32
    fixed = 4 * weight_bytes + (2 << 20)
    if per_image + fixed > io_budget:
        return None
    nb = max(1, (io_budget - fixed) // per_image)
    nb = int(min(nb, N))
    # Keep >= min(N, 4) grid steps: feeds both v7x TensorCores (parallel axis) and
    # keeps the read-DMA / compute / writeback pipeline multi-step on every generation.
    target_steps = min(N, 4)
    nb = int(max(1, min(nb, pl.cdiv(N, target_steps))))
    vmem_limit = int(min(max(nb * per_image + fixed + (4 << 20), 16 << 20), clamp_hi))
    return nb, vmem_limit


def _fused_call(x_flat, w1t, w2t, *, spatial_axis, nb, vmem_limit, mul_in_f32):
    N, d1, d2 = x_flat.shape
    kernel = functools.partial(_se_fused_kernel,
                               spatial_axis=spatial_axis, mul_in_f32=mul_in_f32)
    return pl.pallas_call(
        kernel,
        out_shape=jax.ShapeDtypeStruct((N, d1, d2), x_flat.dtype),
        grid_spec=pltpu.PrefetchScalarGridSpec(
            num_scalar_prefetch=0,
            grid=(pl.cdiv(N, nb),),
            in_specs=[
                pl.BlockSpec((nb, d1, d2), lambda n: (n, 0, 0)),
                pl.BlockSpec(w1t.shape, lambda n: (0, 0)),
                pl.BlockSpec(w2t.shape, lambda n: (0, 0)),
            ],
            out_specs=pl.BlockSpec((nb, d1, d2), lambda n: (n, 0, 0)),
        ),
        compiler_params=pltpu.CompilerParams(
            dimension_semantics=("parallel",),
            vmem_limit_bytes=int(vmem_limit),
        ),
    )(x_flat, w1t, w2t)


# ----------------------------------------------------------------------------
# Shared forward (both layouts)
# ----------------------------------------------------------------------------

def _se_forward(x_flat, w_fc1, w_fc2, *, spatial_axis, vmem_io_budget_bytes=None):
    N = x_flat.shape[0]
    if spatial_axis == 1:          # channels-last: (N, HW, C)
        HW, C = x_flat.shape[1], x_flat.shape[2]
    else:                          # channels-first: (N, C, HW)
        C, HW = x_flat.shape[1], x_flat.shape[2]

    w1t = jnp.asarray(w_fc1).T     # (C, C_red)
    w2t = jnp.asarray(w_fc2).T     # (C_red, C)

    vmem_bytes, native_bf16 = _tpu_caps()
    io_budget, clamp_hi = _budgets(vmem_bytes)
    if vmem_io_budget_bytes is not None:   # mainly for testing the fallback path
        io_budget = max(64 << 10, min(int(vmem_io_budget_bytes), clamp_hi - (8 << 20)))

    itemsize = jnp.dtype(x_flat.dtype).itemsize
    per_image_io = HW * C * itemsize
    per_image_f32 = HW * C * 4
    weight_bytes = (w1t.size + w2t.size) * jnp.dtype(w1t.dtype).itemsize
    mul_in_f32 = not (x_flat.dtype == jnp.bfloat16 and native_bf16)

    # ---------------- Fused fast path (2x HBM traffic) --------------------------
    plan = _plan_fused(N, per_image_io, per_image_f32, weight_bytes,
                       io_budget, clamp_hi, mul_in_f32)
    if plan is not None:
        nb, vmem_limit = plan
        return _fused_call(x_flat, w1t, w2t, spatial_axis=spatial_axis,
                           nb=nb, vmem_limit=vmem_limit, mul_in_f32=mul_in_f32)

    # ---------------- Two-pass fallback (3x HBM traffic) ------------------------
    # (a) squeeze/excite over all N in XLA; f32 accumulation fused into the reduce
    #     (no f32 copy of x materialized in HBM).
    m = jnp.mean(x_flat, axis=spatial_axis, dtype=jnp.float32)                 # (N, C)
    h = jnp.maximum(m @ w1t.astype(jnp.float32), 0.0)                          # (N, C_red)
    s = jax.nn.sigmoid(h @ w2t.astype(jnp.float32))                            # (N, C)
    s_dtype = x_flat.dtype if not mul_in_f32 else jnp.float32

    # (b) streaming lane/sublane-aligned scale kernel.
    sub = max(8, 32 // itemsize)                    # sublane packing: 8/16/32 f32/bf16/int8
    per_elem_bytes = 4 * itemsize + (8 if mul_in_f32 else 0)   # dbl-buffered io + f32 temps
    max_block_elems = max(io_budget // per_elem_bytes, 1)

    if spatial_axis == 1:
        # (N, HW, C): tile HW (sublanes), keep C (lanes) full -> lane-dense stores.
        s3 = s.astype(s_dtype).reshape(N, 1, C)
        hw_tile = max(sub, (max_block_elems // C) // sub * sub)
        hw_tile = int(min(hw_tile, HW))
        vmem_limit = int(min(max(hw_tile * C * per_elem_bytes + (4 << 20), 16 << 20),
                             clamp_hi))
        return pl.pallas_call(
            _se_scale_kernel,
            out_shape=jax.ShapeDtypeStruct(x_flat.shape, x_flat.dtype),
            grid_spec=pltpu.PrefetchScalarGridSpec(
                num_scalar_prefetch=0,
                grid=(N, pl.cdiv(HW, hw_tile)),
                in_specs=[
                    pl.BlockSpec((1, 1, C), lambda n, t: (n, 0, 0)),
                    pl.BlockSpec((1, hw_tile, C), lambda n, t: (n, t, 0)),
                ],
                out_specs=pl.BlockSpec((1, hw_tile, C), lambda n, t: (n, t, 0)),
            ),
            compiler_params=pltpu.CompilerParams(
                dimension_semantics=("parallel", "parallel"),
                vmem_limit_bytes=vmem_limit,
            ),
        )(s3, x_flat)

    # (N, C, HW): tile C (sublanes) and, if still too big, HW (lanes, 128-multiples).
    s3 = s.astype(s_dtype).reshape(N, C, 1)
    if C * HW <= max_block_elems:
        c_tile, hw_tile = C, HW
    else:
        rows_fit = max_block_elems // HW
        if rows_fit >= sub:
            c_tile = int(min(C, (rows_fit // sub) * sub))
            hw_tile = HW
        else:
            c_tile = int(min(C, sub))
            lanes_fit = max_block_elems // max(c_tile, 1)
            if lanes_fit >= HW or HW <= 128:
                hw_tile = HW
            else:
                hw_tile = int(max(128, (lanes_fit // 128) * 128))
    vmem_limit = int(min(max(c_tile * hw_tile * per_elem_bytes + (4 << 20), 16 << 20),
                         clamp_hi))
    return pl.pallas_call(
        _se_scale_kernel,
        out_shape=jax.ShapeDtypeStruct(x_flat.shape, x_flat.dtype),
        grid_spec=pltpu.PrefetchScalarGridSpec(
            num_scalar_prefetch=0,
            grid=(N, pl.cdiv(C, c_tile), pl.cdiv(HW, hw_tile)),
            in_specs=[
                pl.BlockSpec((1, c_tile, 1), lambda n, c, t: (n, c, 0)),
                pl.BlockSpec((1, c_tile, hw_tile), lambda n, c, t: (n, c, t)),
            ],
            out_specs=pl.BlockSpec((1, c_tile, hw_tile), lambda n, c, t: (n, c, t)),
        ),
        compiler_params=pltpu.CompilerParams(
            dimension_semantics=("parallel", "parallel", "parallel"),
            vmem_limit_bytes=vmem_limit,
        ),
    )(s3, x_flat)


# ----------------------------------------------------------------------------
# Public entry points
# ----------------------------------------------------------------------------

def se_module(x_nchw, w_fc1, w_fc2, *, vmem_io_budget_bytes=None):
    """SE forward, native channels-first (PyTorch) layout — no transposes.

    x_nchw: (N, C, H, W)
    w_fc1 : (C_red, C)   -- Conv2d(C, C_red, 1).weight squeezed
    w_fc2 : (C, C_red)   -- Conv2d(C_red, C, 1).weight squeezed
    """
    N, C, H, W = x_nchw.shape
    out = _se_forward(x_nchw.reshape(N, C, H * W), w_fc1, w_fc2,
                      spatial_axis=2, vmem_io_budget_bytes=vmem_io_budget_bytes)
    return out.reshape(N, C, H, W)


def se_module_nhwc(x_nhwc, w_fc1, w_fc2, *, vmem_io_budget_bytes=None):
    """SE forward, channels-last layout (preferred when the model is channels-last)."""
    N, H, W, C = x_nhwc.shape
    out = _se_forward(x_nhwc.reshape(N, H * W, C), w_fc1, w_fc2,
                      spatial_axis=1, vmem_io_budget_bytes=vmem_io_budget_bytes)
    return out.reshape(N, H, W, C)


def se_reference(x, w_fc1, w_fc2):
    """Pure-JAX NCHW reference matching the PyTorch module (f32 math)."""
    xf = x.astype(jnp.float32)
    m = jnp.mean(xf, axis=(2, 3))
    h = jnp.maximum(m @ jnp.asarray(w_fc1, jnp.float32).T, 0.0)
    s = jax.nn.sigmoid(h @ jnp.asarray(w_fc2, jnp.float32).T)
    return xf * s[:, :, None, None]


# ----------------------------------------------------------------------------
# Self-test
# ----------------------------------------------------------------------------

if __name__ == "__main__":
    key = jax.random.PRNGKey(0)

    # --- Test 1: NCHW entry, small config, fused path (native channels-first) ---
    N, C, H, W = 2, 4, 16, 16
    C_red = C // 2
    kx, k1, k2, key = jax.random.split(key, 4)
    x = jax.random.normal(kx, (N, C, H, W), dtype=jnp.float32)
    w1 = jax.random.normal(k1, (C_red, C), dtype=jnp.float32) * 0.5
    w2 = jax.random.normal(k2, (C, C_red), dtype=jnp.float32) * 0.5
    out = jax.block_until_ready(se_module(x, w1, w2))
    ref = se_reference(x, w1, w2)
    assert out.shape == (N, C, H, W)
    assert jnp.allclose(out, ref, atol=1e-4, rtol=1e-4), "NCHW fused path mismatch"

    # --- Test 2: NCHW entry, two-pass streaming fallback (tiny budget override) ---
    N2, C2, H2, W2 = 2, 256, 20, 20
    C2r = C2 // 4
    kx, k1, k2, key = jax.random.split(key, 4)
    x2 = jax.random.normal(kx, (N2, C2, H2, W2), dtype=jnp.float32)
    w1b = jax.random.normal(k1, (C2r, C2), dtype=jnp.float32) * 0.05
    w2b = jax.random.normal(k2, (C2, C2r), dtype=jnp.float32) * 0.05
    out2 = jax.block_until_ready(
        se_module(x2, w1b, w2b, vmem_io_budget_bytes=256 * 1024))
    ref2 = se_reference(x2, w1b, w2b)
    assert jnp.allclose(out2, ref2, atol=1e-4, rtol=1e-4), "NCHW two-pass mismatch"

    # --- Test 3: NHWC entry, fused path, bf16 activations (native bf16 mul on v6e/v7x) ---
    N3, C3, H3, W3 = 4, 128, 8, 8
    C3r = C3 // 16
    kx, k1, k2, key = jax.random.split(key, 4)
    x3 = jax.random.normal(kx, (N3, C3, H3, W3), dtype=jnp.float32).astype(jnp.bfloat16)
    w13 = jax.random.normal(k1, (C3r, C3), dtype=jnp.float32) * 0.1
    w23 = jax.random.normal(k2, (C3, C3r), dtype=jnp.float32) * 0.1
    x3_nhwc = jnp.transpose(x3, (0, 2, 3, 1))
    out3 = jax.block_until_ready(se_module_nhwc(x3_nhwc, w13, w23))
    out3_nchw = jnp.transpose(out3, (0, 3, 1, 2)).astype(jnp.float32)
    ref3 = se_reference(x3, w13, w23)
    assert jnp.allclose(out3_nchw, ref3, atol=5e-2, rtol=5e-2), "NHWC bf16 fused mismatch"

    # --- Test 4: NHWC entry, two-pass streaming fallback (tiny budget override) ---
    x4_nhwc = jnp.transpose(x2, (0, 2, 3, 1))
    out4 = jax.block_until_ready(
        se_module_nhwc(x4_nhwc, w1b, w2b, vmem_io_budget_bytes=256 * 1024))
    out4_nchw = jnp.transpose(out4, (0, 3, 1, 2))
    assert jnp.allclose(out4_nchw, ref2, atol=1e-4, rtol=1e-4), "NHWC two-pass mismatch"

    print("KERNEL_OK")
</pallas_src>

<mosaic_0001>
module attributes {stable_mosaic.version = 11 : i64} {
  func.func @_se_fused_kernel(%arg0: i32, %arg1: memref<1x4x256xf32, #tpu.memory_space<vmem>>, %arg2: memref<4x2xf32, #tpu.memory_space<vmem>>, %arg3: memref<2x4xf32, #tpu.memory_space<vmem>>, %arg4: memref<1x4x256xf32, #tpu.memory_space<vmem>>) attributes {dimension_semantics = [#tpu.dimension_semantics<parallel>], iteration_bounds = array<i64: 2>, scalar_prefetch = 0 : i64, scratch_operands = 0 : i64, tpu.core_type = #tpu.core_type<tc>, window_params = [{transform_indices = @transform_0, window_bounds = array<i64: 1, 4, 256>}, {pipeline_mode = #tpu.pipeline_mode<synchronous>, transform_indices = @transform_1, window_bounds = array<i64: 4, 2>}, {pipeline_mode = #tpu.pipeline_mode<synchronous>, transform_indices = @transform_2, window_bounds = array<i64: 2, 4>}, {transform_indices = @transform_3, window_bounds = array<i64: 1, 4, 256>}]} {
    %c0 = arith.constant 0 : index
    %c0_0 = arith.constant 0 : index
    %c0_1 = arith.constant 0 : index
    %0 = vector.load %arg1[%c0, %c0_0, %c0_1] : memref<1x4x256xf32, #tpu.memory_space<vmem>>, vector<1x4x256xf32>
    %cst = arith.constant dense<0.000000e+00> : vector<1x4xf32>
    %1 = vector.multi_reduction <add>, %0, %cst [2] : vector<1x4x256xf32> to vector<1x4xf32>
    %cst_2 = arith.constant 3.906250e-03 : f32
    %2 = vector.broadcast %cst_2 : f32 to vector<1x4xf32>
    %3 = arith.mulf %1, %2 : vector<1x4xf32>
    %c0_3 = arith.constant 0 : index
    %c0_4 = arith.constant 0 : index
    %4 = vector.load %arg2[%c0_3, %c0_4] : memref<4x2xf32, #tpu.memory_space<vmem>>, vector<4x2xf32>
    %cst_5 = arith.constant dense<0.000000e+00> : vector<1x2xf32>
    %5 = tpu.matmul %3, %4, %cst_5 {dimension_numbers = #tpu.dot_dimension_numbers<[1], [0], [0], [1], [0, 0, 1, 1], [], []>} : vector<1x4xf32>, vector<4x2xf32>, vector<1x2xf32> -> vector<1x2xf32>
    %cst_6 = arith.constant 0.000000e+00 : f32
    %6 = vector.broadcast %cst_6 : f32 to vector<1x2xf32>
    %7 = arith.maximumf %5, %6 : vector<1x2xf32>
    %c0_7 = arith.constant 0 : index
    %c0_8 = arith.constant 0 : index
    %8 = vector.load %arg3[%c0_7, %c0_8] : memref<2x4xf32, #tpu.memory_space<vmem>>, vector<2x4xf32>
    %cst_9 = arith.constant dense<0.000000e+00> : vector<1x4xf32>
    %9 = tpu.matmul %7, %8, %cst_9 {dimension_numbers = #tpu.dot_dimension_numbers<[1], [0], [0], [1], [0, 0, 1, 1], [], []>} : vector<1x2xf32>, vector<2x4xf32>, vector<1x4xf32> -> vector<1x4xf32>
    %10 = arith.negf %9 : vector<1x4xf32>
    %11 = math.exp %10 : vector<1x4xf32>
    %cst_10 = arith.constant 1.000000e+00 : f32
    %12 = vector.broadcast %cst_10 : f32 to vector<1x4xf32>
    %13 = arith.addf %12, %11 : vector<1x4xf32>
    %14 = arith.divf %12, %13 : vector<1x4xf32>
    %15 = vector.shape_cast %14 : vector<1x4xf32> to vector<1x4x1xf32>
    %c0_11 = arith.constant 0 : index
    %c0_12 = arith.constant 0 : index
    %c0_13 = arith.constant 0 : index
    %16 = vector.load %arg1[%c0_11, %c0_12, %c0_13] : memref<1x4x256xf32, #tpu.memory_space<vmem>>, vector<1x4x256xf32>
    %17 = vector.broadcast %15 : vector<1x4x1xf32> to vector<1x4x256xf32>
    %18 = arith.mulf %16, %17 : vector<1x4x256xf32>
    %c0_14 = arith.constant 0 : index
    %c0_15 = arith.constant 0 : index
    %c0_16 = arith.constant 0 : index
    %19 = vector.load %arg4[%c0_14, %c0_15, %c0_16] : memref<1x4x256xf32, #tpu.memory_space<vmem>>, vector<1x4x256xf32>
    tpu.vector_store %arg4[%c0_14, %c0_15, %c0_16], %18 {strides = array<i32>} : memref<1x4x256xf32, #tpu.memory_space<vmem>>, vector<1x4x256xf32>,
    return
  }
  func.func @transform_0(%arg0: i32) -> (i32, i32, i32) {
    %c0_i32 = arith.constant 0 : i32
    %c0_i32_0 = arith.constant 0 : i32
    %c0_i32_1 = arith.constant 0 : i32
    return %arg0, %c0_i32, %c0_i32_0 : i32, i32, i32
  }
  func.func @transform_1(%arg0: i32) -> (i32, i32) {
    %c0_i32 = arith.constant 0 : i32
    %c0_i32_0 = arith.constant 0 : i32
    %c0_i32_1 = arith.constant 0 : i32
    return %c0_i32, %c0_i32_0 : i32, i32
  }
  func.func @transform_2(%arg0: i32) -> (i32, i32) {
    %c0_i32 = arith.constant 0 : i32
    %c0_i32_0 = arith.constant 0 : i32
    %c0_i32_1 = arith.constant 0 : i32
    return %c0_i32, %c0_i32_0 : i32, i32
  }
  func.func @transform_3(%arg0: i32) -> (i32, i32, i32) {
    %c0_i32 = arith.constant 0 : i32
    %c0_i32_0 = arith.constant 0 : i32
    %c0_i32_1 = arith.constant 0 : i32
    return %arg0, %c0_i32, %c0_i32_0 : i32, i32, i32
  }
}

</mosaic_0001>

<bundles_post_ra>
// kernel: tpu_custom_call.1
= control target key start
LH: loop header
LB: loop body
LE: loop exit
PB: predicated region body
PF: predicated region fallthrough
CT: control target
= control target key end

     0   :  { %8 = vsyncpa [#allocation3], 0  ;;  %s854_s0 = inlined_call_operand.hbm [shape: f32[2,4,256], index: 0, kind: input, shape index: {}]   ;;  %s855_s1 = inlined_call_operand.vmem [shape: f32[4,2], index: 1, kind: input, shape index: {}]   ;;  %s856_s2 = inlined_call_operand.vmem [shape: f32[2,4], index: 2, kind: input, shape index: {}]   ;;  %s857_s3 = inlined_call_operand.hbm [shape: f32[2,4,256], index: 3, kind: output, shape index: {}]  }
   0x1   :  { %10 = vsyncpa [#allocation3 + $0x1], 0 }
   0x2   :  { %11 = vsyncpa [#allocation4], 0 }
   0x3   :  { %13 = vsyncpa [#allocation4 + $0x1], 0  ;;  %s683_s12 = smov 0   ;;  %s685_s13 = smov 0  }
   0x4   :  { %s687_s14 = smov 0   ;;  %s689_s15 = smov 0  }
   0x5 LB: > { %s704_s16 = sadd.s32 4294967295, %s656_s15   ;;  %s471_s17 = sadd.s32 4294967294, %s656_s15   ;;  %s656_s15 = sphi %s689_s15, %s872_s15   ;;  %s652_s14 = sphi %s687_s14, %s871_s14   ;;  %s648_s13 = sphi %s685_s13, %s870_s13   ;;  %s644_s12 = sphi %s683_s12, %s869_s12  }
   0x6   : > { %s708_s18 = sadd.s32 1, %s656_s15   ;;  %s26_s19 = sadd.s32 1, %s652_s14 }
   0x7   : > { %s23_s20 = ssub.s32 %s656_s15, %s708_s18  ;;  %p33_p0 = scmp.ne.s32.totalorder %s652_s14, %s648_s13 }
   0x8   : > { %p24_p1 = scmp.eq.s32.totalorder %s23_s20, 0  ;;  %p34_p2 = scmp.eq.s32.totalorder %s656_s15, 0 }
   0x9   : > { %p39_p3 = scmp.ne.s32.totalorder %s648_s13, %s644_s12  ;;  %p40_p4 = scmp.eq.s32.totalorder %s704_s16, 0 }
   0xa   : > { %s720_s21 = scalar_select %p24_p1, %s652_s14, %s26_s19  }
   0xb   : > { %p722_p5 = por %p34_p2, %p33_p0  ;;  %p726_p6 = por %p40_p4, %p39_p3 }
   0xc   : > { %p105_p7 = scmp.eq.s32.totalorder %s704_s16, 1  ;;  %p111_p8 = scmp.eq.s32.totalorder %s471_s17, 1 }
   0xd   : > { %p518_p10 = scmp.lt.s32.totalorder %s656_s15, 2  ;;  %s137_s26 = sand.u32 1, %s652_s14  }
   0xe   : > { %p733_p11 = por %p105_p7, %p33_p0  ;;  %p737_p12 = por %p111_p8, %p39_p3 }
   0xf   : > { %s490_s27 = sshll.u32 %s656_s15, 7  ;;  %s474_s28 = sshll.u32 %s137_s26, 3 }
  0x10   : > { %s861_s24 = scalar_select %p733_p11, 1, 0 }
  0x11   : > { %s862_s25 = scalar_select %p737_p12, 1, 0 }
  0x12   : > { %s746_s4 = scalar_lea.hbm %s854_s0, %s490_s27  ;;  %s141_s5 = scalar_lea.vmem [#allocation2], %s474_s28 }
  0x13   : > { %s149_s6 = sshll.u32 %s141_s5, 4  ;;  %p750_p13 = pnand %p518_p10, %p722_p5  ;;  %s754_s6 = int_to_ptr.vmem [resolvable:$true] %s149_s6 }
  0x14   : > { %s138_s8 = scalar_lea.sflag [#allocation3], %s137_s26  ;;  %s560_s9 = scalar_lea.hbm %s746_s4, 128 }
  0x15   : > { %p561_p2 = scmp.ne.s32.totalorder %s746_s4, %s560_s9  ;;  %p562_p3 = pneg %p750_p13 }
  0x16   : > { %s565_s17 = scalar_lea.hbm %s854_s0, 256  ;;  %p566_p5 = scmp.lt.u32.totalorder %s746_s4, %s854_s0 }
  0x17   : > { %p563_p4 = pnand %p562_p3, %p561_p2  ;;  %p567_p8 = scmp.lt.u32.totalorder %s565_s17, %s560_s9 }
  0x18   : > { %p569_p9 = scmp.lt.u32.totalorder %s560_s9, %s746_s4 }
  0x19   : > { %p564_p7 = pneg %p563_p4  ;;  %p568_p10 = por %p567_p8, %p566_p5 }
  0x1b   : > { %p570_p0 = por %p569_p9, %p568_p10 }
  0x1d   : > { %p571_p1 = pnand %p570_p0, %p564_p7 }
  0x1f   : > { %574 = shalt.err (!%p571_p1)
}
  0x20   : > { %s575_s22 = scalar_lea.vmem %s754_s6, 128  ;;  %s658_s26 = smov [#allocation2]  }
  0x21   : > { %p576_p2 = scmp.ne.s32.totalorder %s754_s6, %s575_s22  ;;  %s580_s27 = sshll.u32 %s658_s26, 4  ;;  %s581_s27 = int_to_ptr.vmem [resolvable:$false] %s580_s27 }
  0x22   : > { %s582_s28 = scalar_lea.vmem %s581_s27, 256  ;;  %p583_p11 = scmp.lt.s32.totalorder %s754_s6, %s581_s27 }
  0x23   : > { %p578_p4 = pnand %p576_p2, %p562_p3  ;;  %p584_p5 = scmp.lt.s32.totalorder %s582_s28, %s575_s22 }
  0x25   : > { %p579_p12 = pneg %p578_p4  ;;  %p585_p8 = por %p584_p5, %p583_p11 }
  0x27   : > { %p586_p9 = pnand %p585_p8, %p579_p12 }
  0x29   : > { %589 = shalt.err (!%p586_p9)
}
  0x2a   : > { %513 = dma.hbm_to_vmem [thread:$0]  (!%p750_p13), %s746_s4, 128, %s754_s6, %s138_s8  }
  0x2b   : > { %p864_p0 = scmp.lt.s32.totalorder %s656_s15, 3  ;;  %p865_p1 = scmp.ge.s32.totalorder %s656_s15, 1 }
  0x2d   : > { %p155_p3 = pnand %p865_p1, %p864_p0 }
  0x2e   : > { %s788_s29 = sand.u32 (!%p155_p3), 1, %s648_s13  }
  0x2f   : > { %158 = sbr.rel (%p155_p3) target bundleno = 794 (0x31a), region = 32  ;;  %s478_s30 = sshll.u32 (!%p155_p3), %s788_s29, 3 }
  0x30   : > { %s161_s5 = scalar_lea.sflag (!%p155_p3), [#allocation3], %s788_s29  ;;  %s164_s7 = scalar_lea.vmem (!%p155_p3), [#allocation2], %s478_s30 }
  0x36   : > { %635 = dma.done.wait (%p726_p6), %s161_s5, 128  }
  0x37   : > { %637 = vsyncadd (%p726_p6), %s161_s5, 4294967168  ;;  %vm191_vm0 = vcmask 1043456   ;;  %v187_v0 = vld [vmem:[%s164_s7] sm:$0xff]  ;;  %v659_v5 = vmov 0.0   ;;  %vm660_vm1 = vmmov 0   ;;  %v200_v7 = vlaneseq  ;;  %s491_s9 = sshll.u32 %s704_s16, 7 }
  0x38   : > { %v189_v1 = vcombine.high %v187_v0, %v187_v0  ;;  %v192_v2 = vsel %vm191_vm0, %v187_v0, 0.0  ;;  %496 = vmatprep.subr.mxu0 %v659_v5  ;;  %v198_v6 = vld [vmem:[%s855_s1] sm:$0xf]  ;;  %501 = vmatprep.subr.mxu1 %v659_v5  ;;  %vm206_vm2 = vcmask 31744   ;;  %vm288_vm3 = vcmask 1041408   ;;  %s186_s10 = scalar_lea.vmem [#allocation5], %s478_s30  ;;  %s810_s20 = scalar_lea.hbm %s857_s3, %s491_s9 }
  0x39   : > { %497 = vmatpush3.msk.msra.mxu0 %vm191_vm0, %v198_v6  ;;  %498 = vmatprep.mubr.msk.f32.mxu0 %vm660_vm1, %v659_v5  ;;  %v201_v8 = vand.u32 127, %v200_v7  ;;  %v203_v9 = vshrl.u32 %v200_v7, 7  ;;  %v283_v14 = vld [vmem:[%s856_s2] sm:$0x3]  ;;  %vm284_vm4 = vcmask 15360   ;;  %s401_s11 = sshll.u32 %s186_s10, 4  ;;  %s812_s11 = int_to_ptr.vmem [resolvable:$true] %s401_s11 }
  0x3a   : > { %v193_v3 = vsel %vm191_vm0, %v189_v1, 0.0  ;;  %503 = vmatprep.mubr.msk.f32.mxu1 %vm660_vm1, %v659_v5  ;;  %502 = vmatpush3.msk.msra.mxu1 %vm288_vm3, %v283_v14  ;;  %v661_v26 = vmov 839922192   ;;  %s387_s22 = scalar_lea.sflag [#allocation4], %s788_s29  ;;  %s590_s26 = scalar_lea.vmem %s812_s11, 128 }
  0x3b   : > { %v194_v4 = vadd.f32 %v193_v3, %v192_v2  ;;  %v204_v10 = vsub.s32 %v201_v8, %v203_v9  ;;  %v370_v23 = vsub.s32 0, %v203_v9  ;;  %v377_v27 = vunpack.c.l.s4 %v661_v26  ;;  %p591_p6 = scmp.ne.s32.totalorder %s812_s11, %s590_s26  ;;  %p866_p11 = scmp.ne.s32.totalorder %s861_s24, 0 }
  0x3c   : > { %s662_s16 = smov [#allocation5]  }
  0x3d   : > { %195 = vadd.xlane.f32.xlu0 %v194_v4  ;;  %v378_v28 = vunpack.c.0.s8 %v377_v27  ;;  %p592_p12 = pnand %p591_p6, %p866_p11  ;;  %s594_s27 = sshll.u32 %s662_s16, 4  ;;  %s595_s27 = int_to_ptr.vmem [resolvable:$false] %s594_s27 }
  0x3e   : > { %s596_s28 = scalar_lea.vmem %s595_s27, 256  ;;  %p597_p7 = scmp.lt.s32.totalorder %s812_s11, %s595_s27 }
  0x3f   : > { %v381_v29 = vsub.s32 %v378_v28, %v203_v9  ;;  %p593_p13 = pneg %p592_p12  ;;  %p598_p10 = scmp.lt.s32.totalorder %s596_s28, %s590_s26 }
  0x41   : > { %p599_p2 = por %p598_p10, %p597_p7 }
  0x43   : > { %p600_p4 = pnand %p599_p2, %p593_p13 }
  0xca   : > { %v196_v11 = vpop.xlane.xlu0 %195 }
  0xcb   : > { %v197_v12 = vmul.f32 0.00390625, %v196_v11 }
  0xcd   : > { %v205_v13 = vrot.slane %v197_v12, %v204_v10 }
  0xcf   : > { %499 = vmatmul.mubr.msk.f32.vlgmr.msra.gmra.mrb[0].mxu0 %vm206_vm2, %v205_v13 }
 0x1a2   : > { %v278_v15 = vpop.f32.mrb[0].mxu0 }
 0x1a3   : > { %v282_v16 = vmax.f32 %v278_v15, 0.0  ;;  %v500_v17 = vpop.f32.mrb[1].mxu0 }
 0x1a5   : > { %504 = vmatmul.mubr.msk.f32.vlgmr.msra.gmra.mrb[0].mxu1 %vm284_vm4, %v282_v16 }
 0x278   : > { %v358_v18 = vpop.f32.mrb[0].mxu1 }
 0x279   : > { %v484_v19 = vmul.f32 -1.442695, %v358_v18  ;;  %v505_v20 = vpop.f32.mrb[1].mxu1 }
 0x27b   : > { %556 = vpow2.f32 %v484_v19 }
 0x285   : > { %v557_v21 = vpop.eup %556 }
 0x286   : > { %v365_v22 = vadd.f32 1.0, %v557_v21 }
 0x288   : > { %558 = vrcp.f32 %v365_v22 }
 0x292   : > { %v559_v24 = vpop.eup %558 }
 0x293   : > { %v371_v25 = vrot.slane %v559_v24, %v370_v23 }
 0x295   : > { %373 = vbcast.lane.b32.xlu0 %v371_v25, 256 }
 0x307   : > { %v374_v30 = vpop.permute.xlu0 %373 }
 0x308   : > { %v382_v31 = vrot.slane %v374_v30, %v381_v29 }
 0x30a   : > { %v384_v32 = vmul.f32 %v382_v31, %v187_v0 }
 0x30c   : > { %385 = vst [vmem:[%s186_s10] sm:$0xff] %v384_v32 }
 0x30d   : > { %603 = shalt.err (!%p600_p4)
}
 0x30e   : > { %s604_s29 = scalar_lea.hbm %s810_s20, 128  ;;  %s608_s7 = scalar_lea.hbm %s857_s3, 256 }
 0x30f   : > { %p605_p5 = scmp.ne.s32.totalorder %s810_s20, %s604_s29  ;;  %p609_p0 = scmp.lt.u32.totalorder %s810_s20, %s857_s3 }
 0x310   : > { %p610_p1 = scmp.lt.u32.totalorder %s608_s7, %s604_s29  ;;  %p612_p6 = scmp.lt.u32.totalorder %s604_s29, %s810_s20 }
 0x311   : > { %p606_p8 = pnand %p605_p5, %p866_p11 }
 0x312   : > { %p611_p3 = por %p610_p1, %p609_p0 }
 0x313   : > { %p607_p9 = pneg %p606_p8 }
 0x314   : > { %p613_p12 = por %p612_p6, %p611_p3 }
 0x316   : > { %p614_p13 = pnand %p613_p12, %p607_p9 }
 0x318   : > { %617 = shalt.err (!%p614_p13)
}
 0x319   : > { %508 = dma.vmem_to_hbm [thread:$0]  (%p866_p11), %s812_s11, 128, %s810_s20, %s387_s22  }
 0x31a PF: > { %s413_s23 = sand.u32 1, %s644_s12   ;;  %p867_p7 = scmp.ne.s32.totalorder %s862_s25, 0 }
 0x31b   : > { %p868_p10 = scmp.ge.s32.totalorder %s656_s15, 2  ;;  %s414_s8 = scalar_lea.sflag [#allocation4], %s413_s23 }
 0x31d   : > { %p515_p2 = pnand %p868_p10, %p867_p7 }
 0x31f   : > { %639 = dma.done.wait (!%p515_p2), %s414_s8, 128  }
 0x320   : > { %641 = vsyncadd (!%p515_p2), %s414_s8, 4294967168  ;;  %p16_p4 = scmp.ge.s32.totalorder %s708_s18, 4   ;;  %s869_s12 = smov %s648_s13 }
 0x321   : > { %s870_s13 = smov %s652_s14  ;;  %s871_s14 = smov %s720_s21 }
 0x322   : > { %s872_s15 = smov %s708_s18  ;;  %18 = sbr.rel (!%p16_p4) target bundleno = 5 (0x5), region = 77 }
 0x329   :  { %419 = vsyncpa [#allocation3], 1 }
 0x32a   :  { %421 = vsyncpa [#allocation3 + $0x1], 1 }
 0x32b   :  { %422 = vsyncpa [#allocation4], 1 }
 0x32c   :  { %424 = vsyncpa [#allocation4 + $0x1], 1 }

</bundles_post_ra>
